<compile_context>
chip_gen: v7x
topology: tpu7x:2x2x1
jax: 0.10.0
libtpu: 0.0.40
codegen_flags: <defaults>
</compile_context>

<pallas_src>
import functools

import numpy as np
import jax
import jax.numpy as jnp
from jax.experimental import pallas as pl
from jax.experimental.pallas import tpu as pltpu

_LANES = 128
# (4096, 128) f32 tile = 2 MiB. Double-buffered input + output = 8 MiB VMEM,
# safe under every generation's scoped-VMEM default (v5e: 16 MiB).
_MAX_BLOCK_ROWS = 4096


def _round_up(x, m):
    return ((x + m - 1) // m) * m


def _q_sym_kernel(ainv_ref, w_ref, x_ref, o_ref, *, scales):
    """Elementwise hot path of Q_Sym.forward (tensor-n_lvs branch).

    ainv_ref : SMEM f32[1] (scalar-prefetch)   1 / softplus(a)
    w_ref    : SMEM f32[K] (scalar-prefetch)   softplus(c) * softmask[i] / (n_lvs[i]-1)
    x_ref    : VMEM [block_rows, 128] input tile (native dtype)
    o_ref    : VMEM [block_rows, 128] output tile (native dtype)
    scales   : static Python floats, n_lvs[i] - 1
    """
    # Compute in f32 regardless of I/O dtype (v5e has no bf16 VPU path and the
    # reference numerics are f32).
    x = x_ref[...].astype(jnp.float32)

    # hardtanh(x / a, -1, 1) with the divide folded into a reciprocal multiply.
    x_h = jnp.clip(x * ainv_ref[0], -1.0, 1.0)

    # Hoist all SMEM scalar reads above the unrolled loop (JAX does not CSE the
    # scalar->vreg splats inside the loop).
    ws = [w_ref[i] for i in range(len(scales))]

    # RoundQuant: x.mul(n_lv-1).round().div(n_lv-1) * c * mask
    #          == round(x_h * scale_i) * w_i  (scale_i static, w_i hoisted)
    # TODO(synk): verify via bundle dump whether jnp.round lowers to a single
    # vround on v7x; if it expands, swap in a single-instruction rounding path.
    acc = jnp.round(x_h * scales[0]) * ws[0]
    for i in range(1, len(scales)):
        acc = acc + jnp.round(x_h * scales[i]) * ws[i]

    o_ref[...] = acc.astype(o_ref.dtype)


def _q_sym_jax(flat, a_inv, scales, weights, dtype):
    """Pure-JAX epilogue for the (< 128-element) unaligned tail."""
    x_h = jnp.clip(flat.astype(jnp.float32) * a_inv[0], -1.0, 1.0)
    acc = jnp.zeros_like(x_h)
    for i, s in enumerate(scales):
        acc = acc + jnp.round(x_h * s) * weights[i]
    return acc.astype(dtype)


def q_sym_forward(x, a_raw, c_raw, n_lvs, softmask):
    """Pallas-backed Q_Sym forward (tensor n_lvs branch).

    The scalar-int branch of the PyTorch module is the same computation with
    K == 1, n_lvs = [n_lvs // 2] and softmask = [1.0]; the n_lvs == 0 branch is
    an identity and is handled before calling this function.
    """
    orig_shape = x.shape
    dtype = x.dtype

    flat = x.reshape(-1)
    n = flat.shape[0]

    # ---- scalar math hoisted out of the kernel (numerically stable) ----
    a = jax.nn.softplus(jnp.asarray(a_raw, jnp.float32))
    c = jax.nn.softplus(jnp.asarray(c_raw, jnp.float32))
    mask = jnp.asarray(softmask, jnp.float32).reshape(-1)

    # n_lvs is static config -> bake the scales as Python float constants.
    nlvs_static = tuple(float(v) for v in np.asarray(n_lvs).reshape(-1))
    scales = tuple(v - 1.0 for v in nlvs_static)
    num_lvls = len(scales)

    a_inv = (1.0 / a).reshape(1)
    # TODO(synk): if any candidate n_lv == 1, scale == 0 and this divide gives
    # inf/NaN -- identical to the PyTorch RoundQuant divide-by-zero behavior.
    weights = c * mask / jnp.asarray(scales, jnp.float32)

    # Lane-aligned prefix goes through the kernel; the (< 128-elem) tail is a
    # tiny JAX epilogue. No jnp.pad / output-slice round trip.
    n_main = (n // _LANES) * _LANES

    if n_main == 0:
        out = _q_sym_jax(flat, a_inv, scales, weights, dtype)
        return out.reshape(orig_shape)

    main = flat if n_main == n else flat[:n_main]
    x2d = main.reshape(-1, _LANES)
    rows = x2d.shape[0]

    # Large lane-dense blocks, but always >= 2 grid steps when the tensor is
    # big enough so both v7x TensorCores get work ("parallel" axis).
    block_rows = min(_MAX_BLOCK_ROWS, max(8, _round_up(pl.cdiv(rows, 2), 8)))
    grid = (pl.cdiv(rows, block_rows),)

    kernel = functools.partial(_q_sym_kernel, scales=scales)

    itemsize = jnp.dtype(dtype).itemsize
    cost = pl.CostEstimate(
        flops=(3 + 4 * num_lvls) * n_main,
        transcendentals=0,
        bytes_accessed=2 * n_main * itemsize,
    )

    out2d = pl.pallas_call(
        kernel,
        out_shape=jax.ShapeDtypeStruct((rows, _LANES), dtype),
        grid_spec=pltpu.PrefetchScalarGridSpec(
            num_scalar_prefetch=2,   # a_inv, weights -> SMEM before the grid runs
            grid=grid,
            in_specs=[
                pl.BlockSpec((block_rows, _LANES), lambda i, ainv, w: (i, 0)),
            ],
            out_specs=pl.BlockSpec((block_rows, _LANES), lambda i, ainv, w: (i, 0)),
        ),
        compiler_params=pltpu.CompilerParams(
            dimension_semantics=("parallel",)),
        cost_estimate=cost,
    )(a_inv, weights, x2d)

    out_main = out2d.reshape(-1)
    if n_main == n:
        out = out_main
    else:
        tail = _q_sym_jax(flat[n_main:], a_inv, scales, weights, dtype)
        out = jnp.concatenate([out_main, tail])

    # TODO(synk): no custom_vjp here -- for QAT training a custom_vjp wrapper
    # implementing the STE backward (RoundQuant.backward) is still needed.
    return out.reshape(orig_shape)


def gumbel_softmax(key, logits, tau=1.0):
    """Deterministic (given key) equivalent of F.gumbel_softmax(hard=False)."""
    g = jax.random.gumbel(key, logits.shape, dtype=logits.dtype)
    return jax.nn.softmax((logits + g) / tau)


def _reference(x, a_raw, c_raw, n_lvs, softmask):
    """Pure-JAX reference, written to match the PyTorch forward exactly."""
    a = jax.nn.softplus(jnp.asarray(a_raw, jnp.float32))
    c = jax.nn.softplus(jnp.asarray(c_raw, jnp.float32))
    x_h = jnp.clip(x / a, -1.0, 1.0)
    ref = jnp.zeros_like(x)
    for i, n_lv in enumerate(n_lvs):
        ref = ref + (jnp.round(x_h * (n_lv - 1.0)) / (n_lv - 1.0)) * c * softmask[i]
    return ref


if __name__ == "__main__":
    key = jax.random.PRNGKey(0)
    kx, kg, kx2 = jax.random.split(key, 3)

    # Deterministic parameter init, mirroring Q_Sym.initialize(n_lvs, offset, diff):
    #   a.fill_(log(exp(offset + diff) - 1))  -> softplus(a) == offset + diff
    #   c.fill_(log(exp(offset + diff) - 1))
    #   theta_x = ones(len(n_lvs)) / len(n_lvs)
    n_lvs = [4.0, 8.0, 16.0]           # candidate level counts (2/3/4-bit)
    offset, diff = 1.0, 0.5
    a_raw = jnp.float32(np.log(np.exp(offset + diff) - 1.0))
    c_raw = jnp.float32(np.log(np.exp(offset + diff) - 1.0))
    theta_x = jnp.ones((len(n_lvs),), jnp.float32) / len(n_lvs)

    # gumbel_softmax is stochastic in PyTorch; here it is computed (glue, not
    # hot path) with a fixed PRNG key so the run is fully deterministic.
    softmask = gumbel_softmax(kg, theta_x, tau=1.0)

    # --- test 1: small NCHW activation (lane-aligned flat size) ---
    x = jax.random.normal(kx, (2, 4, 16, 16), dtype=jnp.float32)
    out = jax.block_until_ready(q_sym_forward(x, a_raw, c_raw, n_lvs, softmask))
    ref = _reference(x, a_raw, c_raw, n_lvs, softmask)
    assert out.shape == x.shape and out.dtype == x.dtype
    np.testing.assert_allclose(np.asarray(out), np.asarray(ref), atol=1e-5, rtol=1e-5)

    # --- test 2: unaligned flat size exercises the kernel-prefix + JAX-tail path ---
    x2 = jax.random.normal(kx2, (2, 3, 100), dtype=jnp.float32)   # 600 = 512 + 88
    out2 = jax.block_until_ready(q_sym_forward(x2, a_raw, c_raw, n_lvs, softmask))
    ref2 = _reference(x2, a_raw, c_raw, n_lvs, softmask)
    assert out2.shape == x2.shape and out2.dtype == x2.dtype
    np.testing.assert_allclose(np.asarray(out2), np.asarray(ref2), atol=1e-5, rtol=1e-5)

    print("KERNEL_OK")
</pallas_src>

<mosaic_0001>
module attributes {stable_mosaic.version = 11 : i64} {
  func.func @_q_sym_kernel(%arg0: i32, %arg1: memref<1xf32, #tpu.memory_space<smem>>, %arg2: memref<3xf32, #tpu.memory_space<smem>>, %arg3: memref<8x128xf32, #tpu.memory_space<vmem>>, %arg4: memref<8x128xf32, #tpu.memory_space<vmem>>) attributes {dimension_semantics = [#tpu.dimension_semantics<parallel>], iteration_bounds = array<i64: 2>, scalar_prefetch = 2 : i64, scratch_operands = 0 : i64, tpu.core_type = #tpu.core_type<tc>, window_params = [{transform_indices = @transform_0, window_bounds = array<i64: 8, 128>}, {transform_indices = @transform_1, window_bounds = array<i64: 8, 128>}]} {
    %c0 = arith.constant 0 : index
    %c0_0 = arith.constant 0 : index
    %0 = vector.load %arg3[%c0, %c0_0] : memref<8x128xf32, #tpu.memory_space<vmem>>, vector<8x128xf32>
    %c0_1 = arith.constant 0 : index
    %1 = memref.load %arg1[%c0_1] : memref<1xf32, #tpu.memory_space<smem>>
    %2 = vector.broadcast %1 : f32 to vector<8x128xf32>
    %3 = arith.mulf %0, %2 : vector<8x128xf32>
    %cst = arith.constant -1.000000e+00 : f32
    %cst_2 = arith.constant 1.000000e+00 : f32
    %4 = vector.broadcast %cst : f32 to vector<8x128xf32>
    %5 = arith.maximumf %4, %3 : vector<8x128xf32>
    %6 = vector.broadcast %cst_2 : f32 to vector<8x128xf32>
    %7 = arith.minimumf %6, %5 : vector<8x128xf32>
    %c0_3 = arith.constant 0 : index
    %8 = memref.load %arg2[%c0_3] : memref<3xf32, #tpu.memory_space<smem>>
    %c1 = arith.constant 1 : index
    %9 = memref.load %arg2[%c1] : memref<3xf32, #tpu.memory_space<smem>>
    %c2 = arith.constant 2 : index
    %10 = memref.load %arg2[%c2] : memref<3xf32, #tpu.memory_space<smem>>
    %cst_4 = arith.constant 3.000000e+00 : f32
    %11 = vector.broadcast %cst_4 : f32 to vector<8x128xf32>
    %12 = arith.mulf %7, %11 : vector<8x128xf32>
    %13 = math.roundeven %12 : vector<8x128xf32>
    %14 = vector.broadcast %8 : f32 to vector<8x128xf32>
    %15 = arith.mulf %13, %14 : vector<8x128xf32>
    %cst_5 = arith.constant 7.000000e+00 : f32
    %16 = vector.broadcast %cst_5 : f32 to vector<8x128xf32>
    %17 = arith.mulf %7, %16 : vector<8x128xf32>
    %18 = math.roundeven %17 : vector<8x128xf32>
    %19 = vector.broadcast %9 : f32 to vector<8x128xf32>
    %20 = arith.mulf %18, %19 : vector<8x128xf32>
    %21 = arith.addf %15, %20 : vector<8x128xf32>
    %cst_6 = arith.constant 1.500000e+01 : f32
    %22 = vector.broadcast %cst_6 : f32 to vector<8x128xf32>
    %23 = arith.mulf %7, %22 : vector<8x128xf32>
    %24 = math.roundeven %23 : vector<8x128xf32>
    %25 = vector.broadcast %10 : f32 to vector<8x128xf32>
    %26 = arith.mulf %24, %25 : vector<8x128xf32>
    %27 = arith.addf %21, %26 : vector<8x128xf32>
    %c0_7 = arith.constant 0 : index
    %c0_8 = arith.constant 0 : index
    %28 = vector.load %arg4[%c0_7, %c0_8] : memref<8x128xf32, #tpu.memory_space<vmem>>, vector<8x128xf32>
    tpu.vector_store %arg4[%c0_7, %c0_8], %27 {strides = array<i32>} : memref<8x128xf32, #tpu.memory_space<vmem>>, vector<8x128xf32>,
    return
  }
  func.func @transform_0(%arg0: i32, %arg1: memref<1xf32, #tpu.memory_space<smem>>, %arg2: memref<3xf32, #tpu.memory_space<smem>>) -> (i32, i32) {
    %c0_i32 = arith.constant 0 : i32
    %c0_i32_0 = arith.constant 0 : i32
    return %arg0, %c0_i32 : i32, i32
  }
  func.func @transform_1(%arg0: i32, %arg1: memref<1xf32, #tpu.memory_space<smem>>, %arg2: memref<3xf32, #tpu.memory_space<smem>>) -> (i32, i32) {
    %c0_i32 = arith.constant 0 : i32
    %c0_i32_0 = arith.constant 0 : i32
    return %arg0, %c0_i32 : i32, i32
  }
}

</mosaic_0001>

<bundles_post_ra>
// kernel: tpu_custom_call.1
= control target key start
LH: loop header
LB: loop body
LE: loop exit
PB: predicated region body
PF: predicated region fallthrough
CT: control target
= control target key end

     0   :  { %s616_s0 = inlined_call_operand.<no memory space> [shape: f32[1], index: 0, kind: input, shape index: {}]   ;;  %s617_s1 = inlined_call_operand.vmem [shape: f32[3], index: 1, kind: input, shape index: {}]   ;;  %s618_s2 = inlined_call_operand.hbm [shape: f32[16,128], index: 2, kind: input, shape index: {}]   ;;  %s619_s3 = inlined_call_operand.hbm [shape: f32[16,128], index: 3, kind: output, shape index: {}]  }
   0x1   :  { %8 = sst [smem:[#allocation3]] %s616_s0  ;;  %s9_s16 = sshll.u32 %s617_s1, 4  ;;  %s10_s16 = int_to_ptr.vmem [resolvable:$true] %s9_s16 }
   0x2   :  { %s314_s17 = scalar_lea.vmem %s10_s16, 16  ;;  %p319_p1 = scmp.lt.s32.totalorder %s10_s16, %s10_s16 }
   0x3   :  { %p315_p0 = scmp.ne.s32.totalorder %s10_s16, %s314_s17  ;;  %p320_p2 = scmp.lt.s32.totalorder %s314_s17, %s314_s17 }
   0x5   :  { %p321_p3 = por %p320_p2, %p319_p1 }
   0x7   :  { %p322_p4 = pnand %p321_p3, %p315_p0 }
   0x9   :  { %325 = shalt.err (!%p322_p4)  }
   0xa   :  { %s426_s18 = smov [#allocation4]  }
   0xb   :  { %12 = dma.vmem_to_smem %s10_s16, 16, %s426_s18, [#allocation2] }
   0xc   :  { %400 = dma.done.wait [#allocation2], 16 }
   0xd   :  { %401 = vsyncadd [#allocation2], 4294967280 }
   0xe   :  { %14 = sfence }
   0xf   :  { %15 = vsyncpa [#allocation6], 0 }
  0x10   :  { %17 = vsyncpa [#allocation6 + $0x1], 0 }
  0x11   :  { %18 = vsyncpa [#allocation7], 0 }
  0x12   :  { %20 = vsyncpa [#allocation7 + $0x1], 0  ;;  %s455_s0 = smov 0   ;;  %s457_s1 = smov 0  }
  0x13   :  { %s459_s19 = smov 0   ;;  %s461_s20 = smov 0  }
  0x14 LB: > { %s476_s21 = sadd.s32 4294967295, %s424_s20   ;;  %s249_s22 = sadd.s32 4294967294, %s424_s20   ;;  %s424_s20 = sphi %s461_s20, %s634_s20   ;;  %s420_s19 = sphi %s459_s19, %s633_s19   ;;  %s416_s1 = sphi %s457_s1, %s632_s1   ;;  %s412_s0 = sphi %s455_s0, %s631_s0  }
  0x15   : > { %s480_s23 = sadd.s32 1, %s424_s20   ;;  %s33_s24 = sadd.s32 1, %s420_s19 }
  0x16   : > { %s30_s25 = ssub.s32 %s424_s20, %s480_s23  ;;  %p40_p5 = scmp.ne.s32.totalorder %s420_s19, %s416_s1 }
  0x17   : > { %p31_p6 = scmp.eq.s32.totalorder %s30_s25, 0  ;;  %p41_p7 = scmp.eq.s32.totalorder %s424_s20, 0 }
  0x18   : > { %p46_p8 = scmp.ne.s32.totalorder %s416_s1, %s412_s0  ;;  %p47_p9 = scmp.eq.s32.totalorder %s476_s21, 0 }
  0x19   : > { %s492_s26 = scalar_select %p31_p6, %s420_s19, %s33_s24  }
  0x1a   : > { %p494_p10 = por %p41_p7, %p40_p5  ;;  %p498_p11 = por %p47_p9, %p46_p8 }
  0x1b   : > { %p70_p12 = scmp.eq.s32.totalorder %s476_s21, 1  ;;  %p76_p13 = scmp.eq.s32.totalorder %s249_s22, 1 }
  0x1c   : > { %p279_p1 = scmp.lt.s32.totalorder %s424_s20, 2  ;;  %s96_s4 = sand.u32 1, %s420_s19  }
  0x1d   : > { %p505_p2 = por %p70_p12, %p40_p5  ;;  %p509_p3 = por %p76_p13, %p46_p8 }
  0x1e   : > { %s253_s5 = sshll.u32 %s424_s20, 7  ;;  %s252_s6 = sshll.u32 %s96_s4, 3 }
  0x1f   : > { %s623_s29 = scalar_select %p505_p2, 1, 0 }
  0x20   : > { %s624_s30 = scalar_select %p509_p3, 1, 0 }
  0x21   : > { %s518_s9 = scalar_lea.hbm %s618_s2, %s253_s5  ;;  %s100_s10 = scalar_lea.vmem [#allocation5], %s252_s6 }
  0x22   : > { %s107_s11 = sshll.u32 %s100_s10, 4  ;;  %p522_p4 = pnand %p279_p1, %p494_p10  ;;  %s526_s11 = int_to_ptr.vmem [resolvable:$true] %s107_s11 }
  0x23   : > { %s97_s13 = scalar_lea.sflag [#allocation6], %s96_s4  ;;  %s326_s14 = scalar_lea.hbm %s518_s9, 128 }
  0x24   : > { %p327_p7 = scmp.ne.s32.totalorder %s518_s9, %s326_s14  ;;  %p328_p8 = pneg %p522_p4 }
  0x25   : > { %s331_s17 = scalar_lea.hbm %s618_s2, 256  ;;  %p332_p10 = scmp.lt.u32.totalorder %s518_s9, %s618_s2 }
  0x26   : > { %p329_p9 = pnand %p328_p8, %p327_p7  ;;  %p333_p13 = scmp.lt.u32.totalorder %s331_s17, %s326_s14 }
  0x27   : > { %p335_p0 = scmp.lt.u32.totalorder %s326_s14, %s518_s9 }
  0x28   : > { %p330_p12 = pneg %p329_p9  ;;  %p334_p1 = por %p333_p13, %p332_p10 }
  0x2a   : > { %p336_p5 = por %p335_p0, %p334_p1 }
  0x2c   : > { %p337_p6 = pnand %p336_p5, %p330_p12 }
  0x2e   : > { %340 = shalt.err (!%p337_p6)
}
  0x2f   : > { %s341_s24 = scalar_lea.vmem %s526_s11, 128  ;;  %s427_s25 = smov [#allocation5]  }
  0x30   : > { %p342_p7 = scmp.ne.s32.totalorder %s526_s11, %s341_s24  ;;  %s346_s27 = sshll.u32 %s427_s25, 4  ;;  %s347_s27 = int_to_ptr.vmem [resolvable:$false] %s346_s27 }
  0x31   : > { %s348_s4 = scalar_lea.vmem %s347_s27, 256  ;;  %p349_p2 = scmp.lt.s32.totalorder %s526_s11, %s347_s27 }
  0x32   : > { %p344_p9 = pnand %p342_p7, %p328_p8  ;;  %p350_p10 = scmp.lt.s32.totalorder %s348_s4, %s341_s24 }
  0x34   : > { %p345_p3 = pneg %p344_p9  ;;  %p351_p13 = por %p350_p10, %p349_p2 }
  0x36   : > { %p352_p0 = pnand %p351_p13, %p345_p3 }
  0x38   : > { %355 = shalt.err (!%p352_p0)
}
  0x39   : > { %274 = dma.hbm_to_vmem [thread:$0]  (!%p522_p4), %s518_s9, 128, %s526_s11, %s97_s13  }
  0x3a   : > { %p626_p5 = scmp.lt.s32.totalorder %s424_s20, 3  ;;  %p627_p6 = scmp.ge.s32.totalorder %s424_s20, 1 }
  0x3c   : > { %p113_p8 = pnand %p627_p6, %p626_p5 }
  0x3d   : > { %s560_s5 = sand.u32 (!%p113_p8), 1, %s416_s1  }
  0x3e   : > { %116 = sbr.rel (%p113_p8) target bundleno = 105 (0x69), region = 24  ;;  %s255_s6 = sshll.u32 (!%p113_p8), %s560_s5, 3 }
  0x3f   : > { %s119_s7 = scalar_lea.sflag (!%p113_p8), [#allocation6], %s560_s5  ;;  %s122_s8 = scalar_lea.vmem (!%p113_p8), [#allocation5], %s255_s6 }
  0x45   : > { %403 = dma.done.wait (%p498_p11), %s119_s7, 128  }
  0x46   : > { %405 = vsyncadd (%p498_p11), %s119_s7, 4294967168  ;;  %s142_s10 = sld [smem:[#allocation3]]  ;;  %s258_s11 = sld [smem:[#allocation4 + $0x1]]  ;;  %v141_v1 = vld [vmem:[%s122_s8] sm:$0xff] }
  0x47   : > { %s147_s9 = sld [smem:[#allocation4]]  ;;  %s259_s12 = sld [smem:[#allocation4 + $0x2]] }
  0x48   : > { %s140_s28 = scalar_lea.vmem [#allocation8], %s255_s6  ;;  %s261_s14 = sshll.u32 %s476_s21, 7 }
  0x49   : > { %s179_s13 = sshll.u32 %s140_s28, 4  ;;  %s574_s17 = scalar_lea.hbm %s619_s3, %s261_s14  ;;  %s569_s13 = int_to_ptr.vmem [resolvable:$true] %s179_s13 }
  0x4a   : > { %s166_s18 = scalar_lea.sflag [#allocation7], %s560_s5  ;;  %s356_s22 = scalar_lea.vmem %s569_s13, 128 }
  0x4b   : > { %p357_p11 = scmp.ne.s32.totalorder %s569_s13, %s356_s22  ;;  %p628_p2 = scmp.ne.s32.totalorder %s623_s29, 0 }
  0x4c   : > { %v143_v0 = vstv %s142_s10  ;;  %v156_v8 = vstv %s258_s11  ;;  %s428_s21 = smov [#allocation8]  }
  0x4d   : > { %v144_v2 = vmul.f32 %v143_v0, %v141_v1  ;;  %v152_v7 = vstv %s147_s9  ;;  %v161_v9 = vstv %s259_s12  ;;  %p358_p3 = pnand %p357_p11, %p628_p2  ;;  %s360_s24 = sshll.u32 %s428_s21, 4  ;;  %s361_s24 = int_to_ptr.vmem [resolvable:$false] %s360_s24 }
  0x4e   : > { %s362_s25 = scalar_lea.vmem %s361_s24, 256  ;;  %p363_p12 = scmp.lt.s32.totalorder %s569_s13, %s361_s24 }
  0x4f   : > { %v257_v3 = vclamps-f32 %v144_v2, 1.0  ;;  %p359_p4 = pneg %p358_p3  ;;  %p364_p1 = scmp.lt.s32.totalorder %s362_s25, %s356_s22 }
  0x51   : > { %v150_v4 = vmul.f32 3.0, %v257_v3  ;;  %v154_v5 = vmul.f32 7.0, %v257_v3  ;;  %v159_v6 = vmul.f32 15.0, %v257_v3  ;;  %p365_p7 = por %p364_p1, %p363_p12 }
  0x53   : > { %v264_v10 = vround.rtne.f32 %v150_v4  ;;  %v265_v11 = vround.rtne.f32 %v154_v5  ;;  %v266_v12 = vround.rtne.f32 %v159_v6  ;;  %p366_p9 = pnand %p365_p7, %p359_p4 }
  0x55   : > { %v153_v13 = vmul.f32 %v264_v10, %v152_v7  ;;  %v157_v14 = vmul.f32 %v265_v11, %v156_v8  ;;  %v162_v15 = vmul.f32 %v266_v12, %v161_v9 }
  0x57   : > { %v158_v16 = vadd.f32 %v157_v14, %v153_v13 }
  0x59   : > { %v163_v17 = vadd.f32 %v162_v15, %v158_v16 }
  0x5b   : > { %164 = vst [vmem:[%s140_s28] sm:$0xff] %v163_v17 }
  0x5c   : > { %369 = shalt.err (!%p366_p9)
}
  0x5d   : > { %s370_s27 = scalar_lea.hbm %s574_s17, 128  ;;  %s374_s6 = scalar_lea.hbm %s619_s3, 256 }
  0x5e   : > { %p371_p10 = scmp.ne.s32.totalorder %s574_s17, %s370_s27  ;;  %p375_p5 = scmp.lt.u32.totalorder %s574_s17, %s619_s3 }
  0x5f   : > { %p376_p6 = scmp.lt.u32.totalorder %s374_s6, %s370_s27  ;;  %p378_p11 = scmp.lt.u32.totalorder %s370_s27, %s574_s17 }
  0x60   : > { %p372_p13 = pnand %p371_p10, %p628_p2 }
  0x61   : > { %p377_p8 = por %p376_p6, %p375_p5 }
  0x62   : > { %p373_p0 = pneg %p372_p13 }
  0x63   : > { %p379_p3 = por %p378_p11, %p377_p8 }
  0x65   : > { %p380_p4 = pnand %p379_p3, %p373_p0 }
  0x67   : > { %383 = shalt.err (!%p380_p4)
}
  0x68   : > { %269 = dma.vmem_to_hbm [thread:$0]  (%p628_p2), %s569_s13, 128, %s574_s17, %s166_s18  }
  0x69 PF: > { %s191_s10 = sand.u32 1, %s412_s0   ;;  %p629_p12 = scmp.ne.s32.totalorder %s624_s30, 0 }
  0x6a   : > { %p630_p1 = scmp.ge.s32.totalorder %s424_s20, 2  ;;  %s192_s9 = scalar_lea.sflag [#allocation7], %s191_s10 }
  0x6c   : > { %p276_p7 = pnand %p630_p1, %p629_p12 }
  0x6e   : > { %407 = dma.done.wait (!%p276_p7), %s192_s9, 128  }
  0x6f   : > { %409 = vsyncadd (!%p276_p7), %s192_s9, 4294967168  ;;  %p23_p9 = scmp.ge.s32.totalorder %s480_s23, 4   ;;  %s631_s0 = smov %s416_s1 }
  0x70   : > { %s632_s1 = smov %s420_s19  ;;  %s633_s19 = smov %s492_s26 }
  0x71   : > { %s634_s20 = smov %s480_s23  ;;  %25 = sbr.rel (!%p23_p9) target bundleno = 20 (0x14), region = 69 }
  0x78   :  { %197 = vsyncpa [#allocation6], 1 }
  0x79   :  { %199 = vsyncpa [#allocation6 + $0x1], 1 }
  0x7a   :  { %200 = vsyncpa [#allocation7], 1 }
  0x7b   :  { %202 = vsyncpa [#allocation7 + $0x1], 1 }

</bundles_post_ra>
